<compile_context>
chip_gen: v6e
topology: v6e:2x2x1
jax: 0.10.0
libtpu: 0.0.40
codegen_flags: <defaults>
</compile_context>

<pallas_src>
import functools

import jax
import jax.numpy as jnp
from jax.experimental import pallas as pl
from jax.experimental.pallas import tpu as pltpu


LEAKY_SLOPE = 0.01   # nn.LeakyReLU default negative_slope
LANE = 128           # TPU lane width


def _round_up(n, m):
    return ((n + m - 1) // m) * m


def _leaky_relu(x):
    return jnp.where(x >= 0, x, LEAKY_SLOPE * x)


def _discriminator_kernel(x_ref, w1_ref, b1_ref, w2_ref, b2_ref, w3_ref, b3_ref,
                          out_ref):
    """One batch tile of the fused forward pass:
         h1 = leaky_relu(x @ W1 + b1)
         h2 = leaky_relu(h1 @ W2 + b2)
         y  = sigmoid(W3_row @ h2^T + b3)     # (1, TB): batch on the lane axis
    """
    # Cast to bf16 in-kernel (VPU) so HBM only ever sees the source-dtype x.
    x = x_ref[...].astype(jnp.bfloat16)                           # (TB, Dp)

    # ---- input_layer: Linear(Dp, Hp) + LeakyReLU (MXU bf16, f32 acc) ----
    h1 = jnp.dot(x, w1_ref[...], preferred_element_type=jnp.float32) + b1_ref[...]
    h1 = _leaky_relu(h1)                                          # (TB, Hp) f32

    # ---- hidden_layer: Linear(Hp, Hp) + LeakyReLU ----
    h2 = jnp.dot(h1.astype(jnp.bfloat16), w2_ref[...],
                 preferred_element_type=jnp.float32) + b2_ref[...]
    h2 = _leaky_relu(h2)                                          # (TB, Hp) f32

    # ---- output_layer: Linear(Hp, 1) + Sigmoid ----
    # Transposed formulation: (1, Hp) contracted against (TB, Hp) over Hp gives a
    # (1, TB) row -> full 128-lane output, dense (unmasked) stores.
    logit = jax.lax.dot_general(
        w3_ref[...], h2.astype(jnp.bfloat16),
        dimension_numbers=(((1,), (1,)), ((), ())),
        preferred_element_type=jnp.float32)                       # (1, TB) f32
    out_ref[...] = jax.nn.sigmoid(logit + b3_ref[0])


def prepare_params(w1, b1, w2, b2, w3, b3):
    """One-time weight prep (call once, reuse every forward):
       * zero-pad d_in and hidden_size up to multiples of 128 (lane-dense layers;
         the padded units have zero weight & bias -> exact same outputs),
       * cast matmul operands to bf16 so the forward never re-reads f32 weights
         just to write bf16 copies.
    Weights are stored [in_features, out_features]."""
    d_in, H = w1.shape
    d_in_p = _round_up(d_in, LANE)
    H_p = _round_up(H, LANE)

    f32 = jnp.float32
    bf16 = jnp.bfloat16
    w1_p = jnp.zeros((d_in_p, H_p), bf16).at[:d_in, :H].set(w1.astype(bf16))
    w2_p = jnp.zeros((H_p, H_p), bf16).at[:H, :H].set(w2.astype(bf16))
    w3_p = jnp.zeros((1, H_p), bf16).at[0, :H].set(w3.reshape(-1).astype(bf16))
    b1_p = jnp.zeros((1, H_p), f32).at[0, :H].set(b1.reshape(-1).astype(f32))
    b2_p = jnp.zeros((1, H_p), f32).at[0, :H].set(b2.reshape(-1).astype(f32))
    b3_p = b3.reshape(1).astype(f32)                  # scalar bias -> SMEM
    return w1_p, b1_p, w2_p, b2_p, w3_p, b3_p


def _vmem_limit_bytes(tb, d_in_p, H_p, x_itemsize):
    """Derive the VMEM budget from the actual footprint, clamped to the chip's
    physical capacity (64 MiB/TC on v7x, 128 MiB on v5e/v6e)."""
    x_buf = 2 * tb * d_in_p * x_itemsize              # double-buffered x tile
    weights = (d_in_p * H_p + H_p * H_p + H_p) * 2    # resident bf16 weights
    biases = 2 * H_p * 4
    out_buf = 2 * tb * 4                              # (1, tb) f32, double-buffered
    acts = 2 * tb * H_p * 4                           # h1 / h2 f32 temporaries
    needed = x_buf + weights + biases + out_buf + acts
    try:
        phys = pltpu.get_tpu_info().vmem_capacity_bytes
    except Exception:
        phys = 64 * 1024 * 1024                       # conservative: v7x per-TC
    return int(min(max(2 * needed + (4 << 20), 32 << 20), int(phys * 0.75)))


@functools.partial(jax.jit, static_argnames=("block_b",))
def discriminator_forward(x, w1, b1, w2, b2, w3, b3, *, block_b=512):
    """x: (B, d_in) f32 (or bf16) -> (B, 1) f32.  Weights must come from
    prepare_params().  Entire MLP runs in one pallas_call."""
    B, d_in = x.shape
    d_in_p, H_p = w1.shape

    # Batch tile: largest requested tile that isn't wastefully larger than B,
    # always a multiple of 128 (lane-dense output store, MXU-friendly rows;
    # default 512 is a multiple of 256 for the v6e/v7x MXU).
    tb = _round_up(min(block_b, _round_up(B, LANE)), LANE)
    n_tiles = pl.cdiv(B, tb)
    b_pad = n_tiles * tb

    # Single fused pad (ragged batch tail + any d_in lane padding); padded rows
    # are zeros -> finite garbage logits that get sliced off below.
    pad_rows = b_pad - B
    pad_cols = d_in_p - d_in
    if pad_rows or pad_cols:
        x = jnp.pad(x, ((0, pad_rows), (0, pad_cols)))

    def _bytes(a):
        return a.size * a.dtype.itemsize

    cost = pl.CostEstimate(
        flops=2 * b_pad * (d_in_p * H_p + H_p * H_p + H_p),
        transcendentals=2 * b_pad,  # sigmoid ~ exp + reciprocal per element
        bytes_accessed=(_bytes(x) + _bytes(w1) + _bytes(w2) + _bytes(w3)
                        + _bytes(b1) + _bytes(b2) + _bytes(b3) + 4 * b_pad),
    )

    out = pl.pallas_call(
        _discriminator_kernel,
        out_shape=jax.ShapeDtypeStruct((1, b_pad), jnp.float32),
        grid_spec=pltpu.PrefetchScalarGridSpec(
            num_scalar_prefetch=0,
            grid=(n_tiles,),
            in_specs=[
                # NOTE: if xprof still shows exposed DMA on the x stream, add
                # pipeline_mode=pl.Buffered(3) to this spec.
                pl.BlockSpec((tb, d_in_p), lambda i: (i, 0)),        # x batch tile
                pl.BlockSpec((d_in_p, H_p), lambda i: (0, 0)),       # W1 (resident)
                pl.BlockSpec((1, H_p), lambda i: (0, 0)),            # b1 (resident)
                pl.BlockSpec((H_p, H_p), lambda i: (0, 0)),          # W2 (resident)
                pl.BlockSpec((1, H_p), lambda i: (0, 0)),            # b2 (resident)
                pl.BlockSpec((1, H_p), lambda i: (0, 0)),            # W3 row (resident)
                pl.BlockSpec(memory_space=pltpu.MemorySpace.SMEM),   # b3 scalar
            ],
            out_specs=pl.BlockSpec((1, tb), lambda i: (0, i)),       # lane-dense
        ),
        compiler_params=pltpu.CompilerParams(
            # "parallel" -> megacore sharding of the batch axis on v7x
            # (no-op on single-TC v5e/v6e).
            dimension_semantics=("parallel",),
            vmem_limit_bytes=_vmem_limit_bytes(tb, d_in_p, H_p, x.dtype.itemsize),
        ),
        cost_estimate=cost,
    )(x, w1, b1, w2, b2, w3, b3)

    # (1, b_pad) lane-major probabilities -> (B, 1)
    return out.reshape(-1)[:B].reshape(B, 1)


def init_params(key, image_size, hidden_size):
    """Deterministic init mimicking PyTorch nn.Linear defaults
    (U(-1/sqrt(fan_in), 1/sqrt(fan_in))). Weights stored [in, out]."""
    d_in = image_size ** 2
    ks = jax.random.split(key, 6)

    def uniform(k, shape, fan_in):
        bound = 1.0 / jnp.sqrt(jnp.float32(fan_in))
        return jax.random.uniform(k, shape, jnp.float32, -bound, bound)

    w1 = uniform(ks[0], (d_in, hidden_size), d_in)
    b1 = uniform(ks[1], (1, hidden_size), d_in)
    w2 = uniform(ks[2], (hidden_size, hidden_size), hidden_size)
    b2 = uniform(ks[3], (1, hidden_size), hidden_size)
    w3 = uniform(ks[4], (hidden_size, 1), hidden_size)
    b3 = uniform(ks[5], (1, 1), hidden_size)
    return w1, b1, w2, b2, w3, b3


def reference_forward(x, w1, b1, w2, b2, w3, b3):
    """Pure-JAX f32 reference for correctness check."""
    h1 = x @ w1 + b1
    h1 = jnp.where(h1 >= 0, h1, LEAKY_SLOPE * h1)
    h2 = h1 @ w2 + b2
    h2 = jnp.where(h2 >= 0, h2, LEAKY_SLOPE * h2)
    return jax.nn.sigmoid(h2 @ w3 + b3)


if __name__ == "__main__":
    image_size = 16     # -> input features = 256
    hidden_size = 32
    batch = 2

    key = jax.random.PRNGKey(0)
    k_x, k_p = jax.random.split(key)

    # Flattened image batch, as the PyTorch module's Linear expects.
    x = jax.random.normal(k_x, (batch, image_size ** 2), jnp.float32)
    raw_params = init_params(k_p, image_size, hidden_size)

    # One-time weight prep (pad + bf16 cast); reused across every forward call.
    prepared = prepare_params(*raw_params)

    out = discriminator_forward(x, *prepared)
    out = jax.block_until_ready(out)

    ref = reference_forward(x, *raw_params)
    assert out.shape == (batch, 1), out.shape
    # Kernel uses bf16 MXU inputs with f32 accumulation -> small tolerance vs f32 ref.
    assert jnp.allclose(out, ref, atol=2e-2, rtol=2e-2), (out, ref)

    print("KERNEL_OK")
</pallas_src>

<mosaic_0001>
module attributes {stable_mosaic.version = 11 : i64} {
  func.func @_discriminator_kernel(%arg0: i32, %arg1: memref<128x256xf32, #tpu.memory_space<vmem>>, %arg2: memref<256x128xbf16, #tpu.memory_space<vmem>>, %arg3: memref<1x128xf32, #tpu.memory_space<vmem>>, %arg4: memref<128x128xbf16, #tpu.memory_space<vmem>>, %arg5: memref<1x128xf32, #tpu.memory_space<vmem>>, %arg6: memref<1x128xbf16, #tpu.memory_space<vmem>>, %arg7: memref<1xf32, #tpu.memory_space<smem>>, %arg8: memref<1x128xf32, #tpu.memory_space<vmem>>) attributes {dimension_semantics = [#tpu.dimension_semantics<parallel>], iteration_bounds = array<i64: 1>, scalar_prefetch = 0 : i64, scratch_operands = 0 : i64, tpu.core_type = #tpu.core_type<tc>, window_params = [{transform_indices = @transform_0, window_bounds = array<i64: 128, 256>}, {pipeline_mode = #tpu.pipeline_mode<synchronous>, transform_indices = @transform_1, window_bounds = array<i64: 256, 128>}, {pipeline_mode = #tpu.pipeline_mode<synchronous>, transform_indices = @transform_2, window_bounds = array<i64: 1, 128>}, {pipeline_mode = #tpu.pipeline_mode<synchronous>, transform_indices = @transform_3, window_bounds = array<i64: 128, 128>}, {pipeline_mode = #tpu.pipeline_mode<synchronous>, transform_indices = @transform_4, window_bounds = array<i64: 1, 128>}, {pipeline_mode = #tpu.pipeline_mode<synchronous>, transform_indices = @transform_5, window_bounds = array<i64: 1, 128>}, {transform_indices = @transform_6, window_bounds = array<i64: 1>}, {transform_indices = @transform_7, window_bounds = array<i64: 1, 128>}]} {
    %c0 = arith.constant 0 : index
    %c0_0 = arith.constant 0 : index
    %0 = vector.load %arg1[%c0, %c0_0] : memref<128x256xf32, #tpu.memory_space<vmem>>, vector<128x256xf32>
    %1 = arith.truncf %0 : vector<128x256xf32> to vector<128x256xbf16>
    %c0_1 = arith.constant 0 : index
    %c0_2 = arith.constant 0 : index
    %2 = vector.load %arg2[%c0_1, %c0_2] : memref<256x128xbf16, #tpu.memory_space<vmem>>, vector<256x128xbf16>
    %cst = arith.constant dense<0.000000e+00> : vector<128x128xf32>
    %3 = tpu.matmul %1, %2, %cst {dimension_numbers = #tpu.dot_dimension_numbers<[1], [0], [0], [1], [0, 0, 1, 1], [], []>} : vector<128x256xbf16>, vector<256x128xbf16>, vector<128x128xf32> -> vector<128x128xf32>
    %c0_3 = arith.constant 0 : index
    %c0_4 = arith.constant 0 : index
    %4 = vector.load %arg3[%c0_3, %c0_4] : memref<1x128xf32, #tpu.memory_space<vmem>>, vector<1x128xf32>
    %5 = vector.broadcast %4 : vector<1x128xf32> to vector<128x128xf32>
    %6 = arith.addf %3, %5 : vector<128x128xf32>
    %cst_5 = arith.constant 0.000000e+00 : f32
    %7 = vector.broadcast %cst_5 : f32 to vector<128x128xf32>
    %8 = arith.cmpf oge, %6, %7 : vector<128x128xf32>
    %cst_6 = arith.constant 0.00999999977 : f32
    %9 = vector.broadcast %cst_6 : f32 to vector<128x128xf32>
    %10 = arith.mulf %9, %6 : vector<128x128xf32>
    %11 = arith.select %8, %6, %10 : vector<128x128xi1>, vector<128x128xf32>
    %12 = arith.truncf %11 : vector<128x128xf32> to vector<128x128xbf16>
    %c0_7 = arith.constant 0 : index
    %c0_8 = arith.constant 0 : index
    %13 = vector.load %arg4[%c0_7, %c0_8] : memref<128x128xbf16, #tpu.memory_space<vmem>>, vector<128x128xbf16>
    %cst_9 = arith.constant dense<0.000000e+00> : vector<128x128xf32>
    %14 = tpu.matmul %12, %13, %cst_9 {dimension_numbers = #tpu.dot_dimension_numbers<[1], [0], [0], [1], [0, 0, 1, 1], [], []>} : vector<128x128xbf16>, vector<128x128xbf16>, vector<128x128xf32> -> vector<128x128xf32>
    %c0_10 = arith.constant 0 : index
    %c0_11 = arith.constant 0 : index
    %15 = vector.load %arg5[%c0_10, %c0_11] : memref<1x128xf32, #tpu.memory_space<vmem>>, vector<1x128xf32>
    %16 = vector.broadcast %15 : vector<1x128xf32> to vector<128x128xf32>
    %17 = arith.addf %14, %16 : vector<128x128xf32>
    %cst_12 = arith.constant 0.000000e+00 : f32
    %18 = vector.broadcast %cst_12 : f32 to vector<128x128xf32>
    %19 = arith.cmpf oge, %17, %18 : vector<128x128xf32>
    %cst_13 = arith.constant 0.00999999977 : f32
    %20 = vector.broadcast %cst_13 : f32 to vector<128x128xf32>
    %21 = arith.mulf %20, %17 : vector<128x128xf32>
    %22 = arith.select %19, %17, %21 : vector<128x128xi1>, vector<128x128xf32>
    %c0_14 = arith.constant 0 : index
    %c0_15 = arith.constant 0 : index
    %23 = vector.load %arg6[%c0_14, %c0_15] : memref<1x128xbf16, #tpu.memory_space<vmem>>, vector<1x128xbf16>
    %24 = arith.truncf %22 : vector<128x128xf32> to vector<128x128xbf16>
    %cst_16 = arith.constant dense<0.000000e+00> : vector<1x128xf32>
    %25 = tpu.matmul %23, %24, %cst_16 {dimension_numbers = #tpu.dot_dimension_numbers<[1], [1], [0], [0], [0, 0, 1, 0], [], []>} : vector<1x128xbf16>, vector<128x128xbf16>, vector<1x128xf32> -> vector<1x128xf32>
    %c0_17 = arith.constant 0 : index
    %26 = memref.load %arg7[%c0_17] : memref<1xf32, #tpu.memory_space<smem>>
    %27 = vector.broadcast %26 : f32 to vector<1x128xf32>
    %28 = arith.addf %25, %27 : vector<1x128xf32>
    %29 = arith.negf %28 : vector<1x128xf32>
    %30 = math.exp %29 : vector<1x128xf32>
    %cst_18 = arith.constant 1.000000e+00 : f32
    %31 = vector.broadcast %cst_18 : f32 to vector<1x128xf32>
    %32 = arith.addf %31, %30 : vector<1x128xf32>
    %33 = arith.divf %31, %32 : vector<1x128xf32>
    %c0_19 = arith.constant 0 : index
    %c0_20 = arith.constant 0 : index
    %34 = vector.load %arg8[%c0_19, %c0_20] : memref<1x128xf32, #tpu.memory_space<vmem>>, vector<1x128xf32>
    tpu.vector_store %arg8[%c0_19, %c0_20], %33 {strides = array<i32>} : memref<1x128xf32, #tpu.memory_space<vmem>>, vector<1x128xf32>,
    return
  }
  func.func @transform_0(%arg0: i32) -> (i32, i32) {
    %c0_i32 = arith.constant 0 : i32
    %c0_i32_0 = arith.constant 0 : i32
    return %arg0, %c0_i32 : i32, i32
  }
  func.func @transform_1(%arg0: i32) -> (i32, i32) {
    %c0_i32 = arith.constant 0 : i32
    %c0_i32_0 = arith.constant 0 : i32
    %c0_i32_1 = arith.constant 0 : i32
    return %c0_i32, %c0_i32_0 : i32, i32
  }
  func.func @transform_2(%arg0: i32) -> (i32, i32) {
    %c0_i32 = arith.constant 0 : i32
    %c0_i32_0 = arith.constant 0 : i32
    %c0_i32_1 = arith.constant 0 : i32
    return %c0_i32, %c0_i32_0 : i32, i32
  }
  func.func @transform_3(%arg0: i32) -> (i32, i32) {
    %c0_i32 = arith.constant 0 : i32
    %c0_i32_0 = arith.constant 0 : i32
    %c0_i32_1 = arith.constant 0 : i32
    return %c0_i32, %c0_i32_0 : i32, i32
  }
  func.func @transform_4(%arg0: i32) -> (i32, i32) {
    %c0_i32 = arith.constant 0 : i32
    %c0_i32_0 = arith.constant 0 : i32
    %c0_i32_1 = arith.constant 0 : i32
    return %c0_i32, %c0_i32_0 : i32, i32
  }
  func.func @transform_5(%arg0: i32) -> (i32, i32) {
    %c0_i32 = arith.constant 0 : i32
    %c0_i32_0 = arith.constant 0 : i32
    %c0_i32_1 = arith.constant 0 : i32
    return %c0_i32, %c0_i32_0 : i32, i32
  }
  func.func @transform_6(%arg0: i32) -> i32 {
    %c0_i32 = arith.constant 0 : i32
    %c0_i32_0 = arith.constant 0 : i32
    return %c0_i32 : i32
  }
  func.func @transform_7(%arg0: i32) -> (i32, i32) {
    %c0_i32 = arith.constant 0 : i32
    %c0_i32_0 = arith.constant 0 : i32
    return %c0_i32, %arg0 : i32, i32
  }
}

</mosaic_0001>

<bundles_post_ra>
// kernel: discriminator_forward.1
= control target key start
LH: loop header
LB: loop body
LE: loop exit
PB: predicated region body
PF: predicated region fallthrough
CT: control target
= control target key end

     0   :  { %s1131_s1 = inlined_call_operand.vmem [shape: bf16[256,128], index: 1, kind: input, shape index: {}]   ;;  %s1132_s0 = inlined_call_operand.vmem [shape: f32[128,256], index: 0, kind: input, shape index: {}]   ;;  %s1133_s3 = inlined_call_operand.vmem [shape: bf16[128,128], index: 3, kind: input, shape index: {}]   ;;  %s1134_s2 = inlined_call_operand.vmem [shape: f32[1,128], index: 2, kind: input, shape index: {}]   ;;  %s1135_s4 = inlined_call_operand.vmem [shape: f32[1,128], index: 4, kind: input, shape index: {}]   ;;  %s1136_s5 = inlined_call_operand.vmem [shape: bf16[1,128], index: 5, kind: input, shape index: {}]   ;;  %s1137_s6 = inlined_call_operand.<no memory space> [shape: f32[1], index: 6, kind: input, shape index: {}]   ;;  %s1138_s7 = inlined_call_operand.vmem [shape: f32[1,128], index: 7, kind: output, shape index: {}]  }
   0x1   :  { %v812_v0 = vld [vmem:[%s1131_s1 + $0x78] sm:$0xff]   ;;  %v814_v2 = vld [vmem:[%s1131_s1 + $0x70] sm:$0xff]   ;;  %v816_v4 = vld [vmem:[%s1131_s1 + $0x68] sm:$0xff]  }
   0x2   :  { %v813_v1 = vld [vmem:[%s1131_s1 + $0x38] sm:$0xff]   ;;  %669 = vmatprep.subr.bf16.mxu0 %v812_v0  ;;  %v815_v3 = vld [vmem:[%s1131_s1 + $0x30] sm:$0xff]   ;;  %v817_v5 = vld [vmem:[%s1131_s1 + $0x28] sm:$0xff]  }
   0x3   :  { %670 = vmatpush3.bf16.msra.mxu0 %v813_v1  ;;  %v818_v6 = vld [vmem:[%s1131_s1 + $0x60] sm:$0xff]   ;;  %v820_v8 = vld [vmem:[%s1131_s1 + $0x58] sm:$0xff]   ;;  %v822_v10 = vld [vmem:[%s1131_s1 + $0x50] sm:$0xff]  }
   0x4   :  { %671 = vmatprep.subr.bf16.mxu0 %v814_v2  ;;  %v819_v7 = vld [vmem:[%s1131_s1 + $0x20] sm:$0xff]   ;;  %v821_v9 = vld [vmem:[%s1131_s1 + $0x18] sm:$0xff]   ;;  %v29_v11 = vld [vmem:[%s1132_s0 + $0x8] sm:$0xff] }
   0x5   :  { %v31_v12 = vld [vmem:[%s1132_s0 + $0x18] sm:$0xff]  ;;  %v823_v14 = vld [vmem:[%s1131_s1 + $0x10] sm:$0xff]   ;;  %v824_v15 = vld [vmem:[%s1131_s1 + $0x48] sm:$0xff]  }
   0x6   :  { %v61_v13 = vpack.c.bf16 %v31_v12, %v29_v11  ;;  %v825_v16 = vld [vmem:[%s1131_s1 + $0x8] sm:$0xff]   ;;  %v826_v17 = vld [vmem:[%s1131_s1 + $0x40] sm:$0xff]   ;;  %v30_v20 = vld [vmem:[%s1132_s0 + $0x10] sm:$0xff] }
   0x7   :  { %672 = vmatpush3.bf16.msra.mxu0 %v815_v3  ;;  %v827_v18 = vld [vmem:[%s1131_s1] sm:$0xff]   ;;  %v33_v21 = vld [vmem:[%s1132_s0 + $0x28] sm:$0xff]  ;;  %v35_v22 = vld [vmem:[%s1132_s0 + $0x38] sm:$0xff] }
   0x8   :  { %673 = vmatprep.subr.bf16.mxu0 %v816_v4  ;;  %243 = vmatprep.mubr.bf16.mxu0 %v61_v13  ;;  %v28_v19 = vld [vmem:[%s1132_s0] sm:$0xff]  ;;  %v828_v23 = vld [vmem:[%s1133_s3 + $0x38] sm:$0xff]   ;;  %v829_v24 = vld [vmem:[%s1133_s3 + $0x30] sm:$0xff]   ;;  %v63_v26 = vpack.c.bf16 %v35_v22, %v33_v21 }
   0x9   :  { %758 = vmatprep.subr.bf16.mxu1 %v828_v23  ;;  %v60_v25 = vpack.c.bf16 %v30_v20, %v28_v19  ;;  %v32_v27 = vld [vmem:[%s1132_s0 + $0x20] sm:$0xff]  ;;  %v34_v28 = vld [vmem:[%s1132_s0 + $0x30] sm:$0xff]  ;;  %v37_v29 = vld [vmem:[%s1132_s0 + $0x48] sm:$0xff] }
   0xa   :  { %759 = vmatpush3.bf16.msra.mxu1 %v828_v23  ;;  %v39_v30 = vld [vmem:[%s1132_s0 + $0x58] sm:$0xff]  ;;  %v62_v31 = vpack.c.bf16 %v34_v28, %v32_v27  ;;  %v36_v33 = vld [vmem:[%s1132_s0 + $0x40] sm:$0xff]  ;;  %v38_v34 = vld [vmem:[%s1132_s0 + $0x50] sm:$0xff] }
   0xb   :  { %674 = vmatpush3.bf16.msra.mxu0 %v817_v5  ;;  %760 = vmatprep.subr.bf16.mxu1 %v829_v24  ;;  %v65_v32 = vpack.c.bf16 %v39_v30, %v37_v29  ;;  %v41_v35 = vld [vmem:[%s1132_s0 + $0x68] sm:$0xff]  ;;  %v43_v36 = vld [vmem:[%s1132_s0 + $0x78] sm:$0xff]  ;;  %v64_v37 = vpack.c.bf16 %v38_v34, %v36_v33  ;;  %v40_v39 = vld [vmem:[%s1132_s0 + $0x60] sm:$0xff] }
   0xc   :  { %675 = vmatprep.subr.bf16.mxu0 %v818_v6  ;;  %v67_v38 = vpack.c.bf16 %v43_v36, %v41_v35  ;;  %v42_v40 = vld [vmem:[%s1132_s0 + $0x70] sm:$0xff]  ;;  %v45_v41 = vld [vmem:[%s1132_s0 + $0x88] sm:$0xff]  ;;  %v47_v42 = vld [vmem:[%s1132_s0 + $0x98] sm:$0xff] }
   0xd   :  { %v66_v43 = vpack.c.bf16 %v42_v40, %v40_v39  ;;  %v69_v44 = vpack.c.bf16 %v47_v42, %v45_v41  ;;  %v44_v45 = vld [vmem:[%s1132_s0 + $0x80] sm:$0xff]  ;;  %v46_v46 = vld [vmem:[%s1132_s0 + $0x90] sm:$0xff]  ;;  %v49_v47 = vld [vmem:[%s1132_s0 + $0xa8] sm:$0xff] }
   0xe   :  { %761 = vmatpush3.bf16.msra.mxu1 %v829_v24  ;;  %v51_v48 = vld [vmem:[%s1132_s0 + $0xb8] sm:$0xff]  ;;  %v68_v49 = vpack.c.bf16 %v46_v46, %v44_v45  ;;  %v48_v51 = vld [vmem:[%s1132_s0 + $0xa0] sm:$0xff]  ;;  %v50_v52 = vld [vmem:[%s1132_s0 + $0xb0] sm:$0xff] }
   0xf   :  { %676 = vmatpush3.bf16.msra.mxu0 %v819_v7  ;;  %v71_v50 = vpack.c.bf16 %v51_v48, %v49_v47  ;;  %v53_v53 = vld [vmem:[%s1132_s0 + $0xc8] sm:$0xff]  ;;  %v55_v54 = vld [vmem:[%s1132_s0 + $0xd8] sm:$0xff]  ;;  %v70_v55 = vpack.c.bf16 %v50_v52, %v48_v51  ;;  %v52_v57 = vld [vmem:[%s1132_s0 + $0xc0] sm:$0xff] }
  0x10   :  { %677 = vmatprep.subr.bf16.mxu0 %v820_v8  ;;  %v73_v56 = vpack.c.bf16 %v55_v54, %v53_v53  ;;  %v54_v58 = vld [vmem:[%s1132_s0 + $0xd0] sm:$0xff]  ;;  %v57_v59 = vld [vmem:[%s1132_s0 + $0xe8] sm:$0xff]  ;;  %v59_v60 = vld [vmem:[%s1132_s0 + $0xf8] sm:$0xff] }
  0x11   :  { %v72_v61 = vpack.c.bf16 %v54_v58, %v52_v57  ;;  %v75_v62 = vpack.c.bf16 %v59_v60, %v57_v59  ;;  %v56_v63 = vld [vmem:[%s1132_s0 + $0xe0] sm:$0xff]  ;;  %v58_v0 = vld [vmem:[%s1132_s0 + $0xf0] sm:$0xff]  ;;  %v830_v2 = vld [vmem:[%s1133_s3 + $0x28] sm:$0xff]  }
  0x12   :  { %v74_v1 = vpack.c.bf16 %v58_v0, %v56_v63  ;;  %762 = vmatprep.subr.bf16.mxu1 %v830_v2  ;;  %v831_v3 = vld [vmem:[%s1133_s3 + $0x20] sm:$0xff]   ;;  %v832_v4 = vld [vmem:[%s1133_s3 + $0x18] sm:$0xff]   ;;  %v833_v5 = vld [vmem:[%s1133_s3 + $0x10] sm:$0xff]  }
  0x13   :  { %678 = vmatpush3.bf16.msra.mxu0 %v821_v9  ;;  %763 = vmatpush3.bf16.msra.mxu1 %v830_v2  ;;  %v834_v6 = vld [vmem:[%s1133_s3 + $0x8] sm:$0xff]   ;;  %v835_v7 = vld [vmem:[%s1133_s3] sm:$0xff]  }
  0x14   :  { %679 = vmatprep.subr.bf16.mxu0 %v822_v10  ;;  %764 = vmatprep.subr.bf16.mxu1 %v831_v3  ;;  %v1053_v9 = vld [vmem:[%s1134_s2] ss:$0 sm:$0xff] }
  0x17   :  { %680 = vmatpush3.bf16.msra.mxu0 %v823_v14  ;;  %765 = vmatpush3.bf16.msra.mxu1 %v831_v3 }
  0x18   :  { %681 = vmatprep.subr.bf16.mxu0 %v824_v15  ;;  %766 = vmatprep.subr.bf16.mxu1 %v832_v4 }
  0x1b   :  { %682 = vmatpush3.bf16.msra.mxu0 %v825_v16  ;;  %767 = vmatpush3.bf16.msra.mxu1 %v832_v4 }
  0x1c   :  { %683 = vmatprep.subr.bf16.mxu0 %v826_v17  ;;  %768 = vmatprep.subr.bf16.mxu1 %v833_v5 }
  0x1f   :  { %684 = vmatpush3.bf16.msra.mxu0 %v827_v18  ;;  %769 = vmatpush3.bf16.msra.mxu1 %v833_v5 }
  0x20   :  { %770 = vmatprep.subr.bf16.mxu1 %v834_v6 }
  0x22   :  { %244 = vmatmul.mubr.bf16.vlgmr.msra.gmra.mxu0 %v60_v25 }
  0x23   :  { %251 = vmatprep.mubr.bf16.mxu0 %v63_v26  ;;  %771 = vmatpush3.bf16.msra.mxu1 %v834_v6 }
  0x24   :  { %772 = vmatprep.subr.bf16.mxu1 %v835_v7 }
  0x27   :  { %773 = vmatpush3.bf16.msra.mxu1 %v835_v7 }
  0x2a   :  { %252 = vmatmul.mubr.bf16.gmra.mxu0 %v62_v31 }
  0x2b   :  { %259 = vmatprep.mubr.bf16.mxu0 %v65_v32 }
  0x32   :  { %260 = vmatmul.mubr.bf16.gmra.mxu0 %v64_v37 }
  0x33   :  { %267 = vmatprep.mubr.bf16.mxu0 %v67_v38 }
  0x3a   :  { %268 = vmatmul.mubr.bf16.gmra.mxu0 %v66_v43 }
  0x3b   :  { %275 = vmatprep.mubr.bf16.mxu0 %v69_v44 }
  0x42   :  { %276 = vmatmul.mubr.bf16.gmra.mxu0 %v68_v49 }
  0x43   :  { %283 = vmatprep.mubr.bf16.mxu0 %v71_v50 }
  0x4a   :  { %284 = vmatmul.mubr.bf16.gmra.mxu0 %v70_v55 }
  0x4b   :  { %291 = vmatprep.mubr.bf16.mxu0 %v73_v56 }
  0x52   :  { %292 = vmatmul.mubr.bf16.gmra.mxu0 %v72_v61 }
  0x53   :  { %299 = vmatprep.mubr.bf16.mxu0 %v75_v62 }
  0x5a   :  { %300 = vmatmul.mubr.bf16.gmra.mxu0 %v74_v1 }
  0xe2   :  { %v685_v8 = vpop.f32.mrf.mxu0 }
  0xe4   :  { %v686_v10 = vpop.f32.mrf.mxu0 }
  0xe5   :  { %v687_v11 = vadd.f32 %v686_v10, %v685_v8 }
  0xe6   :  { %v688_v12 = vpop.f32.mrf.mxu0 }
  0xe7   :  { %v246_v13 = vadd.f32 %v687_v11, %v1053_v9 }
  0xe8   :  { %v689_v14 = vpop.f32.mrf.mxu0 }
  0xe9   :  { %v690_v15 = vadd.f32 %v689_v14, %v688_v12  ;;  %v324_v18 = vmul.f32 0.01, %v246_v13  ;;  %vm308_vm0 = vcmp.ge.f32.partialorder %v246_v13, 0.0 }
  0xea   :  { %v691_v16 = vpop.f32.mrf.mxu0 }
  0xeb   :  { %v249_v17 = vadd.f32 %v690_v15, %v1053_v9  ;;  %v340_v24 = vsel %vm308_vm0, %v246_v13, %v324_v18  ;;  %vm841_vm0 = vmmov 0  }
  0xec   :  { %v692_v19 = vpop.f32.mrf.mxu0 }
  0xed   :  { %v693_v20 = vadd.f32 %v692_v19, %v691_v16  ;;  %vm309_vm1 = vcmp.ge.f32.partialorder %v249_v17, 0.0  ;;  %v325_v21 = vmul.f32 0.01, %v249_v17 }
  0xee   :  { %v694_v22 = vpop.f32.mrf.mxu0 }
  0xef   :  { %v254_v23 = vadd.f32 %v693_v20, %v1053_v9  ;;  %v341_v25 = vsel %vm309_vm1, %v249_v17, %v325_v21 }
  0xf0   :  { %v695_v26 = vpop.f32.mrf.mxu0  ;;  %v356_v27 = vpack.c.bf16 %v341_v25, %v340_v24 }
  0xf1   :  { %v696_v28 = vadd.f32 %v695_v26, %v694_v22  ;;  %v326_v30 = vmul.f32 0.01, %v254_v23  ;;  %vm310_vm2 = vcmp.ge.f32.partialorder %v254_v23, 0.0 }
  0xf2   :  { %v697_v29 = vpop.f32.mrf.mxu0  ;;  %774 = vmatprep.mubr.bf16.mxu1 %v356_v27 }
  0xf3   :  { %v257_v31 = vadd.f32 %v696_v28, %v1053_v9  ;;  %v342_v37 = vsel %vm310_vm2, %v254_v23, %v326_v30 }
  0xf4   :  { %v698_v32 = vpop.f32.mrf.mxu0 }
  0xf5   :  { %vm311_vm3 = vcmp.ge.f32.partialorder %v257_v31, 0.0  ;;  %v327_v33 = vmul.f32 0.01, %v257_v31  ;;  %v699_v34 = vadd.f32 %v698_v32, %v697_v29 }
  0xf6   :  { %v700_v35 = vpop.f32.mrf.mxu0 }
  0xf7   :  { %v262_v36 = vadd.f32 %v699_v34, %v1053_v9  ;;  %v343_v38 = vsel %vm311_vm3, %v257_v31, %v327_v33 }
  0xf8   :  { %v701_v39 = vpop.f32.mrf.mxu0  ;;  %v357_v40 = vpack.c.bf16 %v343_v38, %v342_v37 }
  0xf9   :  { %v702_v41 = vadd.f32 %v701_v39, %v700_v35  ;;  %v328_v43 = vmul.f32 0.01, %v262_v36  ;;  %vm312_vm4 = vcmp.ge.f32.partialorder %v262_v36, 0.0 }
  0xfa   :  { %v703_v42 = vpop.f32.mrf.mxu0  ;;  %775 = vmatmul.mubr.bf16.vlgmr.msra.gmra.mxu1 %v357_v40 }
  0xfb   :  { %v265_v44 = vadd.f32 %v702_v41, %v1053_v9  ;;  %v344_v50 = vsel %vm312_vm4, %v262_v36, %v328_v43 }
  0xfc   :  { %v704_v45 = vpop.f32.mrf.mxu0 }
  0xfd   :  { %vm313_vm5 = vcmp.ge.f32.partialorder %v265_v44, 0.0  ;;  %v329_v46 = vmul.f32 0.01, %v265_v44  ;;  %v705_v47 = vadd.f32 %v704_v45, %v703_v42 }
  0xfe   :  { %v706_v48 = vpop.f32.mrf.mxu0 }
  0xff   :  { %v270_v49 = vadd.f32 %v705_v47, %v1053_v9  ;;  %v345_v51 = vsel %vm313_vm5, %v265_v44, %v329_v46 }
 0x100   :  { %v707_v52 = vpop.f32.mrf.mxu0  ;;  %v358_v53 = vpack.c.bf16 %v345_v51, %v344_v50  ;;  %v840_v50 = vmov 0.0   ;;  %v1076_v51 = vld [vmem:[%s1135_s4] ss:$0 sm:$0xff] }
 0x101   :  { %v708_v54 = vadd.f32 %v707_v52, %v706_v48  ;;  %v330_v56 = vmul.f32 0.01, %v270_v49  ;;  %vm314_vm6 = vcmp.ge.f32.partialorder %v270_v49, 0.0  ;;  %790 = vmatprep.subr.bf16.mxu0 %v840_v50  ;;  %806 = vmatprep.mubr.msk.bf16.mxu0 %vm841_vm0, %v840_v50 }
 0x102   :  { %v709_v55 = vpop.f32.mrf.mxu0  ;;  %778 = vmatprep.mubr.bf16.mxu1 %v358_v53 }
 0x103   :  { %v273_v57 = vadd.f32 %v708_v54, %v1053_v9  ;;  %v346_v63 = vsel %vm314_vm6, %v270_v49, %v330_v56 }
 0x104   :  { %v710_v58 = vpop.f32.mrf.mxu0 }
 0x105   :  { %vm315_vm7 = vcmp.ge.f32.partialorder %v273_v57, 0.0  ;;  %v331_v59 = vmul.f32 0.01, %v273_v57  ;;  %v711_v60 = vadd.f32 %v710_v58, %v709_v55 }
 0x106   :  { %v712_v61 = vpop.f32.mrf.mxu0 }
 0x107   :  { %v278_v62 = vadd.f32 %v711_v60, %v1053_v9  ;;  %v347_v0 = vsel %vm315_vm7, %v273_v57, %v331_v59 }
 0x108   :  { %v713_v1 = vpop.f32.mrf.mxu0  ;;  %v359_v2 = vpack.c.bf16 %v347_v0, %v346_v63 }
 0x109   :  { %v714_v3 = vadd.f32 %v713_v1, %v712_v61  ;;  %v332_v5 = vmul.f32 0.01, %v278_v62  ;;  %vm316_vm8 = vcmp.ge.f32.partialorder %v278_v62, 0.0 }
 0x10a   :  { %v715_v4 = vpop.f32.mrf.mxu0  ;;  %779 = vmatmul.mubr.bf16.gmra.mxu1 %v359_v2 }
 0x10b   :  { %v281_v6 = vadd.f32 %v714_v3, %v1053_v9  ;;  %v348_v13 = vsel %vm316_vm8, %v278_v62, %v332_v5 }
 0x10c   :  { %v716_v7 = vpop.f32.mrf.mxu0 }
 0x10d   :  { %vm317_vm9 = vcmp.ge.f32.partialorder %v281_v6, 0.0  ;;  %v333_v8 = vmul.f32 0.01, %v281_v6  ;;  %v717_v10 = vadd.f32 %v716_v7, %v715_v4 }
 0x10e   :  { %v718_v11 = vpop.f32.mrf.mxu0 }
 0x10f   :  { %v286_v12 = vadd.f32 %v717_v10, %v1053_v9  ;;  %v349_v14 = vsel %vm317_vm9, %v281_v6, %v333_v8 }
 0x110   :  { %v719_v15 = vpop.f32.mrf.mxu0  ;;  %v360_v16 = vpack.c.bf16 %v349_v14, %v348_v13 }
 0x111   :  { %v720_v17 = vadd.f32 %v719_v15, %v718_v11  ;;  %v334_v19 = vmul.f32 0.01, %v286_v12  ;;  %vm318_vm10 = vcmp.ge.f32.partialorder %v286_v12, 0.0 }
 0x112   :  { %v721_v18 = vpop.f32.mrf.mxu0  ;;  %782 = vmatprep.mubr.bf16.mxu1 %v360_v16 }
 0x113   :  { %v289_v20 = vadd.f32 %v720_v17, %v1053_v9  ;;  %v350_v26 = vsel %vm318_vm10, %v286_v12, %v334_v19 }
 0x114   :  { %v722_v21 = vpop.f32.mrf.mxu0 }
 0x115   :  { %vm319_vm11 = vcmp.ge.f32.partialorder %v289_v20, 0.0  ;;  %v335_v22 = vmul.f32 0.01, %v289_v20  ;;  %v723_v23 = vadd.f32 %v722_v21, %v721_v18 }
 0x116   :  { %v724_v24 = vpop.f32.mrf.mxu0 }
 0x117   :  { %v294_v25 = vadd.f32 %v723_v23, %v1053_v9  ;;  %v351_v27 = vsel %vm319_vm11, %v289_v20, %v335_v22 }
 0x118   :  { %v725_v28 = vpop.f32.mrf.mxu0  ;;  %v361_v29 = vpack.c.bf16 %v351_v27, %v350_v26 }
 0x119   :  { %v726_v30 = vadd.f32 %v725_v28, %v724_v24  ;;  %v336_v32 = vmul.f32 0.01, %v294_v25  ;;  %vm320_vm12 = vcmp.ge.f32.partialorder %v294_v25, 0.0 }
 0x11a   :  { %v727_v31 = vpop.f32.mrf.mxu0  ;;  %783 = vmatmul.mubr.bf16.gmra.mxu1 %v361_v29 }
 0x11b   :  { %v297_v33 = vadd.f32 %v726_v30, %v1053_v9  ;;  %v352_v39 = vsel %vm320_vm12, %v294_v25, %v336_v32 }
 0x11c   :  { %v728_v34 = vpop.f32.mrf.mxu0 }
 0x11d   :  { %vm321_vm13 = vcmp.ge.f32.partialorder %v297_v33, 0.0  ;;  %v337_v35 = vmul.f32 0.01, %v297_v33  ;;  %v729_v36 = vadd.f32 %v728_v34, %v727_v31 }
 0x11e   :  { %v730_v37 = vpop.f32.mrf.mxu0 }
 0x11f   :  { %v302_v38 = vadd.f32 %v729_v36, %v1053_v9  ;;  %v353_v40 = vsel %vm321_vm13, %v297_v33, %v337_v35 }
 0x120   :  { %v731_v41 = vpop.f32.mrf.mxu0  ;;  %v362_v42 = vpack.c.bf16 %v353_v40, %v352_v39 }
 0x121   :  { %v732_v43 = vadd.f32 %v731_v41, %v730_v37  ;;  %v338_v44 = vmul.f32 0.01, %v302_v38  ;;  %vm322_vm14 = vcmp.ge.f32.partialorder %v302_v38, 0.0 }
 0x122   :  { %786 = vmatprep.mubr.bf16.mxu1 %v362_v42 }
 0x123   :  { %v305_v45 = vadd.f32 %v732_v43, %v1053_v9  ;;  %v354_v47 = vsel %vm322_vm14, %v302_v38, %v338_v44 }
 0x125   :  { %vm323_vm15 = vcmp.ge.f32.partialorder %v305_v45, 0.0  ;;  %v339_v46 = vmul.f32 0.01, %v305_v45 }
 0x127   :  { %v355_v48 = vsel %vm323_vm15, %v305_v45, %v339_v46 }
 0x128   :  { %v363_v49 = vpack.c.bf16 %v355_v48, %v354_v47 }
 0x12a   :  { %787 = vmatmul.mubr.bf16.gmra.mxu1 %v363_v49 }
 0x1ba   :  { %v776_v52 = vpop.f32.mrf.mxu1 }
 0x1bb   :  { %v478_v9 = vadd.f32 %v776_v52, %v1076_v51 }
 0x1bc   :  { %v469_v53 = vpop.f32.mrf.mxu1 }
 0x1bd   :  { %v470_v54 = vadd.f32 %v1076_v51, %v469_v53  ;;  %v550_v56 = vmul.f32 0.01, %v478_v9  ;;  %vm534_vm1 = vcmp.ge.f32.partialorder %v478_v9, 0.0 }
 0x1be   :  { %v777_v55 = vpop.f32.mrf.mxu1 }
 0x1bf   :  { %v481_v57 = vadd.f32 %v777_v55, %v1076_v51  ;;  %v548_v59 = vmul.f32 0.01, %v470_v54  ;;  %vm532_vm3 = vcmp.ge.f32.partialorder %v470_v54, 0.0  ;;  %v1082_v62 = vsel %vm534_vm1, %v478_v9, %v550_v56 }
 0x1c0   :  { %v472_v58 = vpop.f32.mrf.mxu1 }
 0x1c1   :  { %vm535_vm2 = vcmp.ge.f32.partialorder %v481_v57, 0.0  ;;  %v551_v60 = vmul.f32 0.01, %v481_v57  ;;  %v473_v61 = vadd.f32 %v1076_v51, %v472_v58  ;;  %v1088_v2 = vsel %vm532_vm3, %v470_v54, %v548_v59 }
 0x1c3   :  { %v1084_v63 = vsel %vm535_vm2, %v481_v57, %v551_v60  ;;  %vm533_vm4 = vcmp.ge.f32.partialorder %v473_v61, 0.0  ;;  %v549_v0 = vmul.f32 0.01, %v473_v61 }
 0x1c4   :  { %v582_v1 = vpack.c.bf16 %v1084_v63, %v1082_v62 }
 0x1c5   :  { %v1090_v3 = vsel %vm533_vm4, %v473_v61, %v549_v0  ;;  %v590_v61 = vstv %s1137_s6 }
 0x1c6   :  { %v581_v4 = vpack.c.bf16 %v1090_v3, %v1088_v2 }
 0x1ca   :  { %v780_v5 = vpop.f32.mrf.mxu1 }
 0x1cb   :  { %v494_v45 = vadd.f32 %v780_v5, %v1076_v51 }
 0x1cc   :  { %v1094_v6 = vpop.f32.mrf.mxu1 }
 0x1cd   :  { %v554_v49 = vmul.f32 0.01, %v494_v45  ;;  %vm538_vm14 = vcmp.ge.f32.partialorder %v494_v45, 0.0  ;;  %v486_v54 = vadd.f32 %v1076_v51, %v1094_v6 }
 0x1ce   :  { %v781_v7 = vpop.f32.mrf.mxu1 }
 0x1cf   :  { %v497_v43 = vadd.f32 %v781_v7, %v1076_v51  ;;  %v570_v53 = vsel %vm538_vm14, %v494_v45, %v554_v49  ;;  %v552_v57 = vmul.f32 0.01, %v486_v54  ;;  %vm536_vm0 = vcmp.ge.f32.partialorder %v486_v54, 0.0 }
 0x1d0   :  { %v488_v8 = vpop.f32.mrf.mxu1 }
 0x1d1   :  { %v555_v48 = vmul.f32 0.01, %v497_v43  ;;  %vm539_vm13 = vcmp.ge.f32.partialorder %v497_v43, 0.0  ;;  %v489_v9 = vadd.f32 %v1076_v51, %v488_v8  ;;  %v568_v59 = vsel %vm536_vm0, %v486_v54, %v552_v57 }
 0x1d3   :  { %v571_v52 = vsel %vm539_vm13, %v497_v43, %v555_v48  ;;  %v553_v56 = vmul.f32 0.01, %v489_v9  ;;  %vm537_vm15 = vcmp.ge.f32.partialorder %v489_v9, 0.0 }
 0x1d4   :  { %v584_v55 = vpack.c.bf16 %v571_v52, %v570_v53 }
 0x1d5   :  { %v569_v58 = vsel %vm537_vm15, %v489_v9, %v553_v56 }
 0x1d6   :  { %v583_v60 = vpack.c.bf16 %v569_v58, %v568_v59 }
 0x1da   :  { %v784_v10 = vpop.f32.mrf.mxu1 }
 0x1db   :  { %v510_v31 = vadd.f32 %v784_v10, %v1076_v51 }
 0x1dc   :  { %v501_v11 = vpop.f32.mrf.mxu1 }
 0x1dd   :  { %v558_v35 = vmul.f32 0.01, %v510_v31  ;;  %vm542_vm10 = vcmp.ge.f32.partialorder %v510_v31, 0.0  ;;  %v502_v39 = vadd.f32 %v1076_v51, %v501_v11 }
 0x1de   :  { %v785_v12 = vpop.f32.mrf.mxu1 }
 0x1df   :  { %v513_v29 = vadd.f32 %v785_v12, %v1076_v51  ;;  %v574_v38 = vsel %vm542_vm10, %v510_v31, %v558_v35  ;;  %v556_v42 = vmul.f32 0.01, %v502_v39  ;;  %vm540_vm12 = vcmp.ge.f32.partialorder %v502_v39, 0.0 }
 0x1e0   :  { %v504_v13 = vpop.f32.mrf.mxu1 }
 0x1e1   :  { %v559_v34 = vmul.f32 0.01, %v513_v29  ;;  %vm543_vm9 = vcmp.ge.f32.partialorder %v513_v29, 0.0  ;;  %v505_v37 = vadd.f32 %v1076_v51, %v504_v13  ;;  %v572_v46 = vsel %vm540_vm12, %v502_v39, %v556_v42 }
 0x1e3   :  { %v575_v36 = vsel %vm543_vm9, %v513_v29, %v559_v34  ;;  %v557_v41 = vmul.f32 0.01, %v505_v37  ;;  %vm541_vm11 = vcmp.ge.f32.partialorder %v505_v37, 0.0 }
 0x1e4   :  { %v586_v40 = vpack.c.bf16 %v575_v36, %v574_v38 }
 0x1e5   :  { %v573_v44 = vsel %vm541_vm11, %v505_v37, %v557_v41 }
 0x1e6   :  { %v585_v47 = vpack.c.bf16 %v573_v44, %v572_v46 }
 0x1ea   :  { %v788_v14 = vpop.f32.mrf.mxu1 }
 0x1eb   :  { %v526_v15 = vadd.f32 %v788_v14, %v1076_v51 }
 0x1ec   :  { %v517_v16 = vpop.f32.mrf.mxu1 }
 0x1ed   :  { %v562_v18 = vmul.f32 0.01, %v526_v15  ;;  %vm546_vm5 = vcmp.ge.f32.partialorder %v526_v15, 0.0  ;;  %v518_v24 = vadd.f32 %v1076_v51, %v517_v16 }
 0x1ee   :  { %v789_v17 = vpop.f32.mrf.mxu1 }
 0x1ef   :  { %v529_v19 = vadd.f32 %v789_v17, %v1076_v51  ;;  %v578_v23 = vsel %vm546_vm5, %v526_v15, %v562_v18  ;;  %v560_v28 = vmul.f32 0.01, %v518_v24  ;;  %vm544_vm8 = vcmp.ge.f32.partialorder %v518_v24, 0.0 }
 0x1f0   :  { %v520_v20 = vpop.f32.mrf.mxu1 }
 0x1f1   :  { %vm547_vm6 = vcmp.ge.f32.partialorder %v529_v19, 0.0  ;;  %v563_v21 = vmul.f32 0.01, %v529_v19  ;;  %v521_v22 = vadd.f32 %v1076_v51, %v520_v20  ;;  %v576_v32 = vsel %vm544_vm8, %v518_v24, %v560_v28  ;;  %v580_v51 = vld [vmem:[%s1136_s5] sm:$0x1] }
 0x1f3   :  { %v579_v25 = vsel %vm547_vm6, %v529_v19, %v563_v21  ;;  %v561_v27 = vmul.f32 0.01, %v521_v22  ;;  %vm545_vm7 = vcmp.ge.f32.partialorder %v521_v22, 0.0 }
 0x1f4   :  { %v588_v26 = vpack.c.bf16 %v579_v25, %v578_v23 }
 0x1f5   :  { %v577_v30 = vsel %vm545_vm7, %v521_v22, %v561_v27 }
 0x1f6   :  { %791 = vmatpush3.bf16.xpose.msra.mxu0 %v588_v26  ;;  %v587_v33 = vpack.c.bf16 %v577_v30, %v576_v32 }
 0x1f7   :  { %792 = vmatprep.subr.bf16.mxu0 %v840_v50 }
 0x1fe   :  { %793 = vmatpush3.bf16.xpose.msra.mxu0 %v587_v33 }
 0x1ff   :  { %794 = vmatprep.subr.bf16.mxu0 %v840_v50 }
 0x206   :  { %795 = vmatpush3.bf16.xpose.msra.mxu0 %v586_v40 }
 0x207   :  { %796 = vmatprep.subr.bf16.mxu0 %v840_v50 }
 0x20e   :  { %797 = vmatpush3.bf16.xpose.msra.mxu0 %v585_v47 }
 0x20f   :  { %798 = vmatprep.subr.bf16.mxu0 %v840_v50 }
 0x216   :  { %799 = vmatpush3.bf16.xpose.msra.mxu0 %v584_v55 }
 0x217   :  { %800 = vmatprep.subr.bf16.mxu0 %v840_v50 }
 0x21e   :  { %801 = vmatpush3.bf16.xpose.msra.mxu0 %v583_v60 }
 0x21f   :  { %802 = vmatprep.subr.bf16.mxu0 %v840_v50 }
 0x226   :  { %803 = vmatpush3.bf16.xpose.msra.mxu0 %v582_v1 }
 0x227   :  { %804 = vmatprep.subr.bf16.mxu0 %v840_v50 }
 0x22e   :  { %805 = vmatpush3.bf16.xpose.msra.mxu0 %v581_v4 }
 0x235   :  { %807 = vmatmul.mubr.bf16.vlgmr.msra.gmra.mxu0 %v580_v51 }
 0x2f5   :  { %v625_v0 = vpop.f32.mrf.mxu0 }
 0x2f6   :  { %v626_v5 = vadd.f32 %v625_v0, %v590_v61 }
 0x2f7   :  { %v808_v6 = vpop.f32.mrf.mxu0 }
 0x2f8   :  { %v668_v62 = vmul.f32 -1.442695, %v626_v5 }
 0x2f9   :  { %v628_v63 = vpop.f32.mrf.mxu0 }
 0x2fa   :  { %836 = vpow2.f32 %v668_v62 }
 0x2fb   :  { %v809_v50 = vpop.f32.mrf.mxu0 }
 0x307   :  { %v837_v1 = vpop.eup %836 }
 0x308   :  { %v634_v7 = vadd.f32 1.0, %v837_v1 }
 0x30a   :  { %838 = vrcp.f32 %v634_v7 }
 0x317   :  { %v839_v2 = vpop.eup %838 }
 0x318   :  { %637 = vst [vmem:[%s1138_s7] sm:$0x1] %v839_v2 }

</bundles_post_ra>
